<compile_context>
chip_gen: v6e
topology: v6e:2x2x1
jax: 0.10.0
libtpu: 0.0.40
codegen_flags: <defaults>
</compile_context>

<pallas_src>
import jax
import jax.numpy as jnp
from jax.experimental import pallas as pl
from jax.experimental.pallas import tpu as pltpu


def _round_up(x, m):
    return (x + m - 1) // m * m


def _conv_bn_hswish_kernel(cols_ref, w_ref, bias_ref, o_ref, acc_ref):
    k = pl.program_id(2)

    @pl.when(k == 0)
    def _():
        acc_ref[...] = jnp.zeros_like(acc_ref)

    # MXU matmul (bf16 inputs, f32 accumulation).
    acc_ref[...] += jnp.dot(cols_ref[...], w_ref[...],
                            preferred_element_type=jnp.float32)

    @pl.when(k == pl.num_programs(2) - 1)
    def _():
        # Folded BatchNorm bias (scale already folded into the weights),
        # then Hardswish: y * clip(y + 3, 0, 6) / 6.
        y = acc_ref[...] + bias_ref[...]
        y = y * jnp.clip(y + 3.0, 0.0, 6.0) * (1.0 / 6.0)
        o_ref[...] = y.astype(o_ref.dtype)


def conv_bn_hswish(x_nchw, weight, gamma, beta, running_mean, running_var,
                   stride, eps=1e-5, compute_dtype=jnp.bfloat16):
    """x_nchw: (N, C_in, H, W) f32. weight: (C_out, C_in, 3, 3) f32. NCHW out."""
    N, C_in, H, W = x_nchw.shape
    C_out = weight.shape[0]
    s = int(stride)

    # NCHW -> NHWC, spatial pad by 1 (padding=1).
    x = jnp.transpose(x_nchw, (0, 2, 3, 1))
    xp = jnp.pad(x, ((0, 0), (1, 1), (1, 1), (0, 0)))

    Ho = (H + 2 - 3) // s + 1
    Wo = (W + 2 - 3) // s + 1

    # im2col in XLA glue: patch taps ordered (kh, kw, cin).
    taps = []
    for kh in range(3):
        for kw in range(3):
            taps.append(
                xp[:, kh:kh + s * (Ho - 1) + 1:s, kw:kw + s * (Wo - 1) + 1:s, :]
            )
    cols = jnp.concatenate(taps, axis=-1)          # (N, Ho, Wo, 9*C_in)

    M = N * Ho * Wo
    K = 9 * C_in
    cols = cols.reshape(M, K)

    # Fold BatchNorm (inference) into the weights + bias.
    scale = gamma / jnp.sqrt(running_var + eps)                 # (C_out,)
    bias = beta - running_mean * scale                          # (C_out,)
    w_mat = jnp.transpose(weight, (2, 3, 1, 0)).reshape(K, C_out)
    w_mat = w_mat * scale[None, :]                              # scale folded

    # ---- Tile selection -------------------------------------------------
    # M (sublane dim): multiple of 8.
    tm = 512 if M >= 512 else _round_up(M, 8)
    Mp = _round_up(M, tm)
    # K (reduction): for small K keep ONE full-K tile (allowed: block dim ==
    # full array dim) -> no zero-padding of the im2col activations.
    if K <= 1024:
        tk, Kp = K, K
    else:
        tk = 512
        Kp = _round_up(K, tk)
    # C_out (lane dim of the output): pad to a multiple of 128 for lane-dense
    # unmasked stores.
    tn = 256 if C_out >= 256 else _round_up(C_out, 128)
    Cp = _round_up(C_out, tn)

    # ---- Pad operands (only where needed) and cast MXU inputs to bf16 ----
    cols_p = cols.astype(compute_dtype)
    if Mp != M or Kp != K:
        cols_p = jnp.pad(cols_p, ((0, Mp - M), (0, Kp - K)))
    w_p = w_mat.astype(compute_dtype)
    if Kp != K or Cp != C_out:
        w_p = jnp.pad(w_p, ((0, Kp - K), (0, Cp - C_out)))
    bias_p = jnp.pad(bias.astype(jnp.float32), (0, Cp - C_out)).reshape(1, Cp)

    grid = (Mp // tm, Cp // tn, Kp // tk)

    itemsize = jnp.dtype(compute_dtype).itemsize
    cost = pl.CostEstimate(
        flops=2 * Mp * Kp * Cp,
        transcendentals=0,
        bytes_accessed=(Mp * Kp * itemsize + Kp * Cp * itemsize
                        + Cp * 4 + Mp * Cp * 4),
    )

    out_p = pl.pallas_call(
        _conv_bn_hswish_kernel,
        out_shape=jax.ShapeDtypeStruct((Mp, Cp), jnp.float32),
        grid_spec=pltpu.PrefetchScalarGridSpec(
            num_scalar_prefetch=0,
            grid=grid,
            in_specs=[
                pl.BlockSpec((tm, tk), lambda i, j, k: (i, k)),
                pl.BlockSpec((tk, tn), lambda i, j, k: (k, j)),
                pl.BlockSpec((1, tn), lambda i, j, k: (0, j)),
            ],
            out_specs=pl.BlockSpec((tm, tn), lambda i, j, k: (i, j)),
            scratch_shapes=[pltpu.VMEM((tm, tn), jnp.float32)],
        ),
        compiler_params=pltpu.CompilerParams(
            dimension_semantics=("parallel", "parallel", "arbitrary")),
        cost_estimate=cost,
    )(cols_p, w_p, bias_p)

    # Strip padding and return NCHW to match the PyTorch module contract.
    out = out_p[:M, :C_out].reshape(N, Ho, Wo, C_out)
    return jnp.transpose(out, (0, 3, 1, 2))


def _reference(x_nchw, weight, gamma, beta, mean, var, stride, eps=1e-5):
    y = jax.lax.conv_general_dilated(
        x_nchw, weight, window_strides=(stride, stride),
        padding=((1, 1), (1, 1)),
        dimension_numbers=("NCHW", "OIHW", "NCHW"))
    scale = (gamma / jnp.sqrt(var + eps)).reshape(1, -1, 1, 1)
    bias = (beta - mean * gamma / jnp.sqrt(var + eps)).reshape(1, -1, 1, 1)
    y = y * scale + bias
    return y * jnp.clip(y + 3.0, 0.0, 6.0) / 6.0


if __name__ == "__main__":
    key = jax.random.PRNGKey(0)
    k_x, k_w, k_g, k_b, k_m, k_v = jax.random.split(key, 6)

    N, C1, H, W = 2, 4, 16, 16
    C2, stride = 8, 2

    x = jax.random.normal(k_x, (N, C1, H, W), dtype=jnp.float32)
    weight = jax.random.normal(k_w, (C2, C1, 3, 3), dtype=jnp.float32) * 0.1
    gamma = jax.random.normal(k_g, (C2,), dtype=jnp.float32) * 0.1 + 1.0
    beta = jax.random.normal(k_b, (C2,), dtype=jnp.float32) * 0.1
    running_mean = jax.random.normal(k_m, (C2,), dtype=jnp.float32) * 0.1
    running_var = jax.random.uniform(k_v, (C2,), dtype=jnp.float32,
                                     minval=0.5, maxval=1.5)

    out = conv_bn_hswish(x, weight, gamma, beta, running_mean, running_var,
                         stride)
    out = jax.block_until_ready(out)

    ref = _reference(x, weight, gamma, beta, running_mean, running_var, stride)
    assert out.shape == ref.shape == (N, C2, H // stride, W // stride)
    # bf16 MXU inputs with f32 accumulation -> loosened tolerance vs f32 ref.
    assert jnp.allclose(out, ref, atol=5e-2, rtol=5e-2), (
        float(jnp.max(jnp.abs(out - ref))))

    print("KERNEL_OK")
</pallas_src>

<mosaic_0001>
module attributes {stable_mosaic.version = 11 : i64} {
  func.func @_conv_bn_hswish_kernel(%arg0: i32, %arg1: i32, %arg2: i32, %arg3: memref<128x36xbf16, #tpu.memory_space<vmem>>, %arg4: memref<36x128xbf16, #tpu.memory_space<vmem>>, %arg5: memref<1x128xf32, #tpu.memory_space<vmem>>, %arg6: memref<128x128xf32, #tpu.memory_space<vmem>>, %arg7: memref<128x128xf32, #tpu.memory_space<vmem>>) attributes {dimension_semantics = [#tpu.dimension_semantics<parallel>, #tpu.dimension_semantics<parallel>, #tpu.dimension_semantics<arbitrary>], iteration_bounds = array<i64: 1, 1, 1>, scalar_prefetch = 0 : i64, scratch_operands = 1 : i64, tpu.core_type = #tpu.core_type<tc>, window_params = [{transform_indices = @transform_0, window_bounds = array<i64: 128, 36>}, {transform_indices = @transform_1, window_bounds = array<i64: 36, 128>}, {transform_indices = @transform_2, window_bounds = array<i64: 1, 128>}, {transform_indices = @transform_3, window_bounds = array<i64: 128, 128>}]} {
    %c0_i32 = arith.constant 0 : i32
    %0 = arith.cmpi eq, %arg2, %c0_i32 : i32
    %1 = arith.extui %0 : i1 to i32
    %c0_i32_0 = arith.constant 0 : i32
    %2 = arith.cmpi ne, %1, %c0_i32_0 : i32
    scf.if %2 {
      %cst_10 = arith.constant 0.000000e+00 : f32
      %12 = vector.broadcast %cst_10 : f32 to vector<128x128xf32>
      %c0_11 = arith.constant 0 : index
      %c0_12 = arith.constant 0 : index
      %13 = vector.load %arg7[%c0_11, %c0_12] : memref<128x128xf32, #tpu.memory_space<vmem>>, vector<128x128xf32>
      tpu.vector_store %arg7[%c0_11, %c0_12], %12 {strides = array<i32>} : memref<128x128xf32, #tpu.memory_space<vmem>>, vector<128x128xf32>,
    } else {
    }
    %c0 = arith.constant 0 : index
    %c0_1 = arith.constant 0 : index
    %3 = vector.load %arg7[%c0, %c0_1] : memref<128x128xf32, #tpu.memory_space<vmem>>, vector<128x128xf32>
    %c0_2 = arith.constant 0 : index
    %c0_3 = arith.constant 0 : index
    %4 = vector.load %arg3[%c0_2, %c0_3] : memref<128x36xbf16, #tpu.memory_space<vmem>>, vector<128x36xbf16>
    %c0_4 = arith.constant 0 : index
    %c0_5 = arith.constant 0 : index
    %5 = vector.load %arg4[%c0_4, %c0_5] : memref<36x128xbf16, #tpu.memory_space<vmem>>, vector<36x128xbf16>
    %cst = arith.constant dense<0.000000e+00> : vector<128x128xf32>
    %6 = tpu.matmul %4, %5, %cst {dimension_numbers = #tpu.dot_dimension_numbers<[1], [0], [0], [1], [0, 0, 1, 1], [], []>} : vector<128x36xbf16>, vector<36x128xbf16>, vector<128x128xf32> -> vector<128x128xf32>
    %7 = arith.addf %3, %6 : vector<128x128xf32>
    %c0_6 = arith.constant 0 : index
    %c0_7 = arith.constant 0 : index
    %8 = vector.load %arg7[%c0_6, %c0_7] : memref<128x128xf32, #tpu.memory_space<vmem>>, vector<128x128xf32>
    tpu.vector_store %arg7[%c0_6, %c0_7], %7 {strides = array<i32>} : memref<128x128xf32, #tpu.memory_space<vmem>>, vector<128x128xf32>,
    %c0_i32_8 = arith.constant 0 : i32
    %9 = arith.cmpi eq, %arg2, %c0_i32_8 : i32
    %10 = arith.extui %9 : i1 to i32
    %c0_i32_9 = arith.constant 0 : i32
    %11 = arith.cmpi ne, %10, %c0_i32_9 : i32
    scf.if %11 {
      %c0_10 = arith.constant 0 : index
      %c0_11 = arith.constant 0 : index
      %12 = vector.load %arg7[%c0_10, %c0_11] : memref<128x128xf32, #tpu.memory_space<vmem>>, vector<128x128xf32>
      %c0_12 = arith.constant 0 : index
      %c0_13 = arith.constant 0 : index
      %13 = vector.load %arg5[%c0_12, %c0_13] : memref<1x128xf32, #tpu.memory_space<vmem>>, vector<1x128xf32>
      %14 = vector.broadcast %13 : vector<1x128xf32> to vector<128x128xf32>
      %15 = arith.addf %12, %14 : vector<128x128xf32>
      %cst_14 = arith.constant 3.000000e+00 : f32
      %16 = vector.broadcast %cst_14 : f32 to vector<128x128xf32>
      %17 = arith.addf %15, %16 : vector<128x128xf32>
      %cst_15 = arith.constant 0.000000e+00 : f32
      %cst_16 = arith.constant 6.000000e+00 : f32
      %18 = vector.broadcast %cst_15 : f32 to vector<128x128xf32>
      %19 = arith.maximumf %18, %17 : vector<128x128xf32>
      %20 = vector.broadcast %cst_16 : f32 to vector<128x128xf32>
      %21 = arith.minimumf %20, %19 : vector<128x128xf32>
      %22 = arith.mulf %15, %21 : vector<128x128xf32>
      %cst_17 = arith.constant 0.166666672 : f32
      %23 = vector.broadcast %cst_17 : f32 to vector<128x128xf32>
      %24 = arith.mulf %22, %23 : vector<128x128xf32>
      %c0_18 = arith.constant 0 : index
      %c0_19 = arith.constant 0 : index
      %25 = vector.load %arg6[%c0_18, %c0_19] : memref<128x128xf32, #tpu.memory_space<vmem>>, vector<128x128xf32>
      tpu.vector_store %arg6[%c0_18, %c0_19], %24 {strides = array<i32>} : memref<128x128xf32, #tpu.memory_space<vmem>>, vector<128x128xf32>,
    } else {
    }
    return
  }
  func.func @transform_0(%arg0: i32, %arg1: i32, %arg2: i32) -> (i32, i32) {
    %c0_i32 = arith.constant 0 : i32
    return %arg0, %arg2 : i32, i32
  }
  func.func @transform_1(%arg0: i32, %arg1: i32, %arg2: i32) -> (i32, i32) {
    %c0_i32 = arith.constant 0 : i32
    return %arg2, %arg1 : i32, i32
  }
  func.func @transform_2(%arg0: i32, %arg1: i32, %arg2: i32) -> (i32, i32) {
    %c0_i32 = arith.constant 0 : i32
    %c0_i32_0 = arith.constant 0 : i32
    return %c0_i32, %arg1 : i32, i32
  }
  func.func @transform_3(%arg0: i32, %arg1: i32, %arg2: i32) -> (i32, i32) {
    %c0_i32 = arith.constant 0 : i32
    return %arg0, %arg1 : i32, i32
  }
}

</mosaic_0001>

<bundles_post_ra>
// kernel: tpu_custom_call.1
= control target key start
LH: loop header
LB: loop body
LE: loop exit
PB: predicated region body
PF: predicated region fallthrough
CT: control target
= control target key end

     0   :  { %vm153_vm0 = vcmask 1041408   ;;  %vm128_vm1 = vcmask 293888   ;;  %s625_s0 = inlined_call_operand.vmem [shape: bf16[128,36], index: 0, kind: input, shape index: {}]   ;;  %s626_s1 = inlined_call_operand.vmem [shape: bf16[36,128], index: 1, kind: input, shape index: {}]   ;;  %s627_s2 = inlined_call_operand.vmem [shape: f32[1,128], index: 2, kind: input, shape index: {}]   ;;  %s628_s3 = inlined_call_operand.hbm [shape: f32[128,128], index: 3, kind: output, shape index: {}]  }
   0x1   :  { %v504_v0 = vld [vmem:[%s626_s1 + $0x10] ss:$0 sps:$4 sm:$0x33]   ;;  %v505_v1 = vld [vmem:[%s626_s1 + $0x8] sm:$0xff]   ;;  %v506_v3 = vld [vmem:[%s626_s1] sm:$0xff]  }
   0x2   :  { %499 = vmatprep.subr.msk.bf16.mxu0 %vm153_vm0, %v504_v0  ;;  %500 = vmatprep.subr.msk.bf16.mxu1 %vm153_vm0, %v504_v0  ;;  %v155_v2 = vsel %vm153_vm0, %v504_v0, 0  ;;  %v507_v4 = vld [vmem:[%s625_s0] sm:$0xff]   ;;  %v509_v6 = vld [vmem:[%s625_s0 + $0x8] sm:$0xff]   ;;  %v511_v8 = vld [vmem:[%s625_s0 + $0x10] sm:$0xff]  }
   0x3   :  { %472 = vmatpush3.bf16.msra.mxu0 %v155_v2  ;;  %496 = vmatpush3.bf16.msra.mxu1 %v155_v2  ;;  %v508_v5 = vld [vmem:[%s625_s0 + $0x20] sm:$0xff]   ;;  %v510_v7 = vld [vmem:[%s625_s0 + $0x28] sm:$0xff]   ;;  %v512_v9 = vld [vmem:[%s625_s0 + $0x30] sm:$0xff]  }
   0x4   :  { %473 = vmatprep.subr.bf16.mxu0 %v505_v1  ;;  %494 = vmatprep.subr.bf16.mxu1 %v505_v1 }
   0x5   :  { %477 = vmatprep.mubr.msk.bf16.mxu0 %vm128_vm1, %v507_v4  ;;  %485 = vmatprep.mubr.msk.bf16.mxu1 %vm128_vm1, %v508_v5 }
   0x7   :  { %474 = vmatpush3.bf16.msra.mxu0 %v505_v1  ;;  %497 = vmatpush3.bf16.msra.mxu1 %v505_v1 }
   0x8   :  { %475 = vmatprep.subr.bf16.mxu0 %v506_v3  ;;  %495 = vmatprep.subr.bf16.mxu1 %v506_v3 }
   0xb   :  { %476 = vmatpush3.bf16.msra.mxu0 %v506_v3  ;;  %498 = vmatpush3.bf16.msra.mxu1 %v506_v3 }
   0xc   :  { %8 = vsyncpa [#allocation4], 0  ;;  %v513_v10 = vld [vmem:[%s625_s0 + $0x18] sm:$0xff]   ;;  %v604_v12 = vld [vmem:[%s627_s2] ss:$0 sm:$0xff] }
   0xd   :  { %v514_v11 = vld [vmem:[%s625_s0 + $0x38] sm:$0xff]   ;;  %s537_s0 = smov [#allocation3]  }
   0xe   :  { %478 = vmatmul.mubr.msk.bf16.vlgmr.msra.gmra.mxu0 %vm128_vm1, %v509_v6  ;;  %486 = vmatmul.mubr.msk.bf16.vlgmr.msra.gmra.mxu1 %vm128_vm1, %v510_v7  ;;  %s429_s2 = sshll.u32 %s537_s0, 4  ;;  %s430_s2 = int_to_ptr.vmem [resolvable:$true] %s429_s2 }
   0xf   :  { %481 = vmatprep.mubr.msk.bf16.mxu0 %vm128_vm1, %v511_v8  ;;  %489 = vmatprep.mubr.msk.bf16.mxu1 %vm128_vm1, %v512_v9  ;;  %s515_s8 = scalar_lea.vmem %s430_s2, 2048  ;;  %p520_p1 = scmp.lt.s32.totalorder %s430_s2, %s430_s2 }
  0x10   :  { %p516_p0 = scmp.ne.s32.totalorder %s430_s2, %s515_s8  ;;  %p521_p2 = scmp.lt.s32.totalorder %s515_s8, %s515_s8 }
  0x12   :  { %p522_p3 = por %p521_p2, %p520_p1 }
  0x14   :  { %p523_p4 = pnand %p522_p3, %p516_p0 }
  0x16   :  { %482 = vmatmul.mubr.msk.bf16.gmra.mxu0 %vm128_vm1, %v513_v10  ;;  %490 = vmatmul.mubr.msk.bf16.gmra.mxu1 %vm128_vm1, %v514_v11 }
  0xce   :  { %v479_v13 = vpop.f32.mrf.mxu0  ;;  %v487_v14 = vpop.f32.mrf.mxu1 }
  0xcf   :  { %v314_v15 = vadd.f32 %v479_v13, %v604_v12  ;;  %v322_v16 = vadd.f32 %v487_v14, %v604_v12 }
  0xd0   :  { %v191_v17 = vpop.f32.mrf.mxu0  ;;  %v223_v18 = vpop.f32.mrf.mxu1 }
  0xd1   :  { %v330_v19 = vadd.f32 3.0, %v314_v15  ;;  %v338_v20 = vadd.f32 3.0, %v322_v16  ;;  %v312_v21 = vadd.f32 %v604_v12, %v191_v17  ;;  %v320_v22 = vadd.f32 %v604_v12, %v223_v18 }
  0xd2   :  { %v480_v23 = vpop.f32.mrf.mxu0  ;;  %v488_v24 = vpop.f32.mrf.mxu1 }
  0xd3   :  { %v346_v25 = vmax.f32 %v330_v19, 0.0  ;;  %v354_v26 = vmax.f32 %v338_v20, 0.0  ;;  %v328_v27 = vadd.f32 3.0, %v312_v21  ;;  %v336_v28 = vadd.f32 3.0, %v320_v22 }
  0xd4   :  { %v315_v29 = vadd.f32 %v480_v23, %v604_v12  ;;  %v323_v30 = vadd.f32 %v488_v24, %v604_v12  ;;  %v194_v31 = vpop.f32.mrf.mxu0  ;;  %v226_v32 = vpop.f32.mrf.mxu1 }
  0xd5   :  { %v362_v33 = vmin.f32 %v346_v25, 6.0  ;;  %v370_v34 = vmin.f32 %v354_v26, 6.0  ;;  %v344_v35 = vmax.f32 %v328_v27, 0.0  ;;  %v352_v36 = vmax.f32 %v336_v28, 0.0 }
  0xd6   :  { %v331_v37 = vadd.f32 3.0, %v315_v29  ;;  %v339_v38 = vadd.f32 3.0, %v323_v30  ;;  %v313_v39 = vadd.f32 %v604_v12, %v194_v31  ;;  %v321_v40 = vadd.f32 %v604_v12, %v226_v32  ;;  %v483_v41 = vpop.f32.mrf.mxu0  ;;  %v491_v42 = vpop.f32.mrf.mxu1 }
  0xd7   :  { %v378_v43 = vmul.f32 %v362_v33, %v314_v15  ;;  %v386_v44 = vmul.f32 %v370_v34, %v322_v16  ;;  %v360_v45 = vmin.f32 %v344_v35, 6.0  ;;  %v368_v46 = vmin.f32 %v352_v36, 6.0 }
  0xd8   :  { %v347_v47 = vmax.f32 %v331_v37, 0.0  ;;  %v355_v48 = vmax.f32 %v339_v38, 0.0  ;;  %v329_v49 = vadd.f32 3.0, %v313_v39  ;;  %v337_v50 = vadd.f32 3.0, %v321_v40  ;;  %v207_v51 = vpop.f32.mrf.mxu0  ;;  %v239_v52 = vpop.f32.mrf.mxu1 }
  0xd9   :  { %v394_v53 = vmul.f32 0.16666667, %v378_v43  ;;  %v402_v54 = vmul.f32 0.16666667, %v386_v44  ;;  %v376_v55 = vmul.f32 %v360_v45, %v312_v21  ;;  %v384_v56 = vmul.f32 %v368_v46, %v320_v22 }
  0xda   :  { %v363_v57 = vmin.f32 %v347_v47, 6.0  ;;  %v371_v58 = vmin.f32 %v355_v48, 6.0  ;;  %v345_v59 = vmax.f32 %v329_v49, 0.0  ;;  %v353_v60 = vmax.f32 %v337_v50, 0.0  ;;  %v484_v1 = vpop.f32.mrf.mxu0  ;;  %v492_v2 = vpop.f32.mrf.mxu1 }
  0xdb   :  { %410 = vst [vmem:[#allocation3 + $0x10] sm:$0xff] %v394_v53  ;;  %418 = vst [vmem:[#allocation3 + $0x50] sm:$0xff] %v402_v54  ;;  %v392_v61 = vmul.f32 0.16666667, %v376_v55  ;;  %v400_v62 = vmul.f32 0.16666667, %v384_v56  ;;  %v318_v63 = vadd.f32 %v483_v41, %v604_v12  ;;  %v326_v0 = vadd.f32 %v491_v42, %v604_v12 }
  0xdc   :  { %v379_v3 = vmul.f32 %v363_v57, %v315_v29  ;;  %v387_v4 = vmul.f32 %v371_v58, %v323_v30  ;;  %v361_v5 = vmin.f32 %v345_v59, 6.0  ;;  %v369_v6 = vmin.f32 %v353_v60, 6.0  ;;  %v210_v20 = vpop.f32.mrf.mxu0  ;;  %v242_v21 = vpop.f32.mrf.mxu1 }
  0xdd   :  { %408 = vst [vmem:[#allocation3] sm:$0xff] %v392_v61  ;;  %416 = vst [vmem:[#allocation3 + $0x40] sm:$0xff] %v400_v62  ;;  %v334_v7 = vadd.f32 3.0, %v318_v63  ;;  %v342_v8 = vadd.f32 3.0, %v326_v0  ;;  %v316_v9 = vadd.f32 %v604_v12, %v207_v51  ;;  %v324_v10 = vadd.f32 %v604_v12, %v239_v52 }
  0xde   :  { %v395_v11 = vmul.f32 0.16666667, %v379_v3  ;;  %v403_v13 = vmul.f32 0.16666667, %v387_v4  ;;  %v377_v14 = vmul.f32 %v361_v5, %v313_v39  ;;  %v385_v15 = vmul.f32 %v369_v6, %v321_v40 }
  0xdf   :  { %v350_v16 = vmax.f32 %v334_v7, 0.0  ;;  %v358_v17 = vmax.f32 %v342_v8, 0.0  ;;  %v332_v18 = vadd.f32 3.0, %v316_v9  ;;  %v340_v19 = vadd.f32 3.0, %v324_v10 }
  0xe0   :  { %411 = vst [vmem:[#allocation3 + $0x18] sm:$0xff] %v395_v11  ;;  %419 = vst [vmem:[#allocation3 + $0x58] sm:$0xff] %v403_v13  ;;  %v393_v22 = vmul.f32 0.16666667, %v377_v14  ;;  %v401_v23 = vmul.f32 0.16666667, %v385_v15  ;;  %v319_v24 = vadd.f32 %v484_v1, %v604_v12  ;;  %v327_v25 = vadd.f32 %v492_v2, %v604_v12 }
  0xe1   :  { %v366_v26 = vmin.f32 %v350_v16, 6.0  ;;  %v374_v27 = vmin.f32 %v358_v17, 6.0  ;;  %v348_v28 = vmax.f32 %v332_v18, 0.0  ;;  %v356_v29 = vmax.f32 %v340_v19, 0.0 }
  0xe2   :  { %409 = vst [vmem:[#allocation3 + $0x8] sm:$0xff] %v393_v22  ;;  %417 = vst [vmem:[#allocation3 + $0x48] sm:$0xff] %v401_v23  ;;  %v335_v30 = vadd.f32 3.0, %v319_v24  ;;  %v343_v31 = vadd.f32 3.0, %v327_v25  ;;  %v317_v32 = vadd.f32 %v604_v12, %v210_v20  ;;  %v325_v33 = vadd.f32 %v604_v12, %v242_v21 }
  0xe3   :  { %v382_v34 = vmul.f32 %v366_v26, %v318_v63  ;;  %v390_v35 = vmul.f32 %v374_v27, %v326_v0  ;;  %v364_v36 = vmin.f32 %v348_v28, 6.0  ;;  %v372_v37 = vmin.f32 %v356_v29, 6.0 }
  0xe4   :  { %v351_v38 = vmax.f32 %v335_v30, 0.0  ;;  %v359_v39 = vmax.f32 %v343_v31, 0.0  ;;  %v333_v40 = vadd.f32 3.0, %v317_v32  ;;  %v341_v41 = vadd.f32 3.0, %v325_v33 }
  0xe5   :  { %v398_v42 = vmul.f32 0.16666667, %v382_v34  ;;  %v406_v43 = vmul.f32 0.16666667, %v390_v35  ;;  %v380_v44 = vmul.f32 %v364_v36, %v316_v9  ;;  %v388_v45 = vmul.f32 %v372_v37, %v324_v10 }
  0xe6   :  { %v367_v46 = vmin.f32 %v351_v38, 6.0  ;;  %v375_v47 = vmin.f32 %v359_v39, 6.0  ;;  %v349_v48 = vmax.f32 %v333_v40, 0.0  ;;  %v357_v49 = vmax.f32 %v341_v41, 0.0 }
  0xe7   :  { %414 = vst [vmem:[#allocation3 + $0x30] sm:$0xff] %v398_v42  ;;  %422 = vst [vmem:[#allocation3 + $0x70] sm:$0xff] %v406_v43  ;;  %v396_v50 = vmul.f32 0.16666667, %v380_v44  ;;  %v404_v12 = vmul.f32 0.16666667, %v388_v45 }
  0xe8   :  { %v383_v51 = vmul.f32 %v367_v46, %v319_v24  ;;  %v391_v52 = vmul.f32 %v375_v47, %v327_v25  ;;  %v365_v53 = vmin.f32 %v349_v48, 6.0  ;;  %v373_v54 = vmin.f32 %v357_v49, 6.0 }
  0xe9   :  { %412 = vst [vmem:[#allocation3 + $0x20] sm:$0xff] %v396_v50  ;;  %420 = vst [vmem:[#allocation3 + $0x60] sm:$0xff] %v404_v12 }
  0xea   :  { %v399_v55 = vmul.f32 0.16666667, %v383_v51  ;;  %v407_v56 = vmul.f32 0.16666667, %v391_v52  ;;  %v381_v57 = vmul.f32 %v365_v53, %v317_v32  ;;  %v389_v58 = vmul.f32 %v373_v54, %v325_v33 }
  0xec   :  { %415 = vst [vmem:[#allocation3 + $0x38] sm:$0xff] %v399_v55  ;;  %423 = vst [vmem:[#allocation3 + $0x78] sm:$0xff] %v407_v56  ;;  %v397_v59 = vmul.f32 0.16666667, %v381_v57  ;;  %v405_v60 = vmul.f32 0.16666667, %v389_v58 }
  0xee   :  { %413 = vst [vmem:[#allocation3 + $0x28] sm:$0xff] %v397_v59  ;;  %421 = vst [vmem:[#allocation3 + $0x68] sm:$0xff] %v405_v60 }
  0xef   :  { %526 = shalt.err (!%p523_p4)
}
  0xf0   :  { %s538_s9 = smov 128   ;;  %s539_s10 = smov 8  }
  0xf1   :  { %435 = dma.vmem_to_hbm [thread:$0]  %s430_s2, 2048, %s628_s3, [#allocation4], %s538_s9, %s538_s9, %s539_s10  }
  0xf2   :  { %535 = dma.done.wait [#allocation4], 2048  }
  0xf3   :  { %536 = vsyncadd [#allocation4], 4294965248 }
  0xf4   :  { %439 = vsyncpa [#allocation4], 1 }

</bundles_post_ra>
